<compile_context>
chip_gen: v7x
topology: tpu7x:2x2x1
jax: 0.10.0
libtpu: 0.0.40
codegen_flags: <defaults>
</compile_context>

<pallas_src>
import functools

import numpy as np
import jax
import jax.numpy as jnp
from jax.experimental import pallas as pl
from jax.experimental.pallas import tpu as pltpu


# ----------------------------- parameter helpers -----------------------------
def precompute_freqs_cis(dim, end, theta=10000.0):
    """Matches the F5-TTS buffer: concat(cos(t*f), sin(t*f)) -> [end, dim]."""
    freqs = 1.0 / (theta ** (jnp.arange(0, dim, 2)[: dim // 2].astype(jnp.float32) / dim))
    t = jnp.arange(end, dtype=jnp.float32)
    f = jnp.outer(t, freqs)                                    # [end, dim//2]
    return jnp.concatenate([jnp.cos(f), jnp.sin(f)], axis=-1)  # [end, dim]


def _round_up(x, m):
    return ((x + m - 1) // m) * m


def _largest_row_tile(rows, cap):
    """Largest multiple-of-8 divisor of `rows` (itself a multiple of 8) that is <= cap."""
    start = min(cap, rows)
    start -= start % 8
    for cand in range(start, 7, -8):
        if rows % cand == 0:
            return cand
    return 8


def pad_embed_table(embed_table):
    """Zero-pad vocab rows to a multiple of 128 lanes.  Call ONCE at init (static weight)."""
    V, D = embed_table.shape
    Vp = _round_up(max(V, 128), 128)
    return jnp.zeros((Vp, D), jnp.float32).at[:V].set(embed_table.astype(jnp.float32))


# ----------------------------- Pallas kernel ---------------------------------
def _text_embed_kernel(tok_ref, embed_ref, pos_ref, o_ref):
    """One flattened row-tile per grid step.

    tok_ref:   (TN, 1)  int32  token ids (already +1 / zeroed for drop_text; pad rows are 0)
    embed_ref: (Vp, D)  f32    embedding table, vocab zero-padded to a multiple of 128
    pos_ref:   (TN, D)  f32    freqs_cis rows for this tile's within-batch positions
    o_ref:     (TN, D)  f32    lane-dense output tile (D is the model dim)
    """
    tok = tok_ref[...]                                          # (TN, 1)
    tn = tok.shape[0]
    vp = embed_ref.shape[0]
    # One-hot rows built on the VPU (lane broadcast of the (TN, 1) token column).
    vocab_ids = jax.lax.broadcasted_iota(jnp.int32, (tn, vp), 1)
    onehot = (vocab_ids == tok).astype(jnp.float32)             # (TN, Vp)
    # Gather-as-matmul on the MXU: exactly one 1.0 per row -> exact f32 lookup.
    emb = jnp.dot(onehot, embed_ref[...], preferred_element_type=jnp.float32)
    o_ref[...] = emb + pos_ref[...]                             # fused positional add


# ----------------------------- forward wrapper --------------------------------
def text_embedding(text, embed_padded, freqs_cis, drop_text=False, max_pos=1024,
                   tile_rows=512, single_step_rows=1024):
    """Pallas forward of TextEmbedding.

    text:         int   [B, NT]
    embed_padded: f32   [Vp, D]    (from pad_embed_table, Vp % 128 == 0)
    freqs_cis:    f32   [max_pos, D]
    returns       f32   [B, NT, D]
    """
    B, NT = text.shape
    Vp, D = embed_padded.shape

    # text = text + 1 ; if drop_text: zeros (drop_text is a static Python bool).
    tok = jnp.zeros_like(text) if drop_text else text + 1
    tok = tok.astype(jnp.int32)

    # Pad per-batch rows to a multiple of 8 sublanes; padded tokens are 0 and their output
    # rows are sliced off below.
    NTp = _round_up(NT, 8)
    if NTp != NT:
        tok = jnp.pad(tok, ((0, 0), (0, NTp - NT)))
    total = B * NTp

    # Positional rows: batch_start is always zeros, so pos_idx = min(arange(NT), max_pos-1),
    # identical for every batch row.
    if NTp <= max_pos:
        pos_full = freqs_cis.astype(jnp.float32)          # only rows [0, NTp) are touched
    else:
        pos_full = freqs_cis[jnp.minimum(jnp.arange(NTp), max_pos - 1)].astype(jnp.float32)

    if total <= max(single_step_rows, 8):
        # Small workload: ONE grid step over all B*NTp rows (per-step launch overhead is the
        # entire budget here).  The tiny pos slab is replicated per batch on the host side.
        TN = total
        pos_rows = jax.lax.slice_in_dim(pos_full, 0, NTp, axis=0)
        pos_arr = jnp.tile(pos_rows, (B, 1)) if B > 1 else pos_rows
        pos_map = lambda t: (0, 0)
    else:
        # Large workload: row tiles (multiple of 8, <= tile_rows) keep pos/out blocks small
        # in VMEM and give >= 2 "parallel" steps for v7x's two TensorCores.  TN divides NTp,
        # so every tile lies inside one batch row and the shared pos slab is indexed with a
        # per-batch wrap (no replication).
        TN = _largest_row_tile(NTp, tile_rows)
        tiles_per_batch = NTp // TN
        pos_arr = pos_full
        if tiles_per_batch == 1:
            pos_map = lambda t: (0, 0)
        else:
            pos_map = lambda t, tpb=tiles_per_batch: (t % tpb, 0)

    num_tiles = total // TN

    out_flat = pl.pallas_call(
        _text_embed_kernel,
        out_shape=jax.ShapeDtypeStruct((total, D), jnp.float32),
        grid=(num_tiles,),
        in_specs=[
            pl.BlockSpec((TN, 1), lambda t: (t, 0)),      # this tile's token ids
            pl.BlockSpec((Vp, D), lambda t: (0, 0)),      # full padded table, stays resident
            pl.BlockSpec((TN, D), pos_map),               # shared positional rows
        ],
        out_specs=pl.BlockSpec((TN, D), lambda t: (t, 0)),
        compiler_params=pltpu.CompilerParams(dimension_semantics=("parallel",)),
    )(tok.reshape(total, 1), embed_padded, pos_arr)

    out = out_flat.reshape(B, NTp, D)
    if NTp != NT:
        out = out[:, :NT]
    return out


# ----------------------------- pure-JAX reference ----------------------------
def text_embedding_ref(text, embed_table, freqs_cis, drop_text=False, max_pos=1024):
    t = text + 1
    if drop_text:
        t = jnp.zeros_like(t)
    emb = jnp.take(embed_table, t, axis=0)                 # [B, NT, D]
    nt = text.shape[1]
    pos_idx = jnp.minimum(jnp.arange(nt), max_pos - 1)
    return emb + freqs_cis[pos_idx][None]


# ----------------------------- demo ------------------------------------------
if __name__ == "__main__":
    D = 128
    TEXT_NUM_EMBEDS = 16
    MAX_POS = 1024

    key = jax.random.PRNGKey(0)
    k_embed, k_text_a, k_text_b = jax.random.split(key, 3)
    embed_table = jax.random.normal(k_embed, (TEXT_NUM_EMBEDS + 1, D), jnp.float32) * 0.02
    freqs_cis = precompute_freqs_cis(D, MAX_POS)
    embed_padded = pad_embed_table(embed_table)            # padded ONCE, outside the jitted fwd

    fwd = jax.jit(functools.partial(text_embedding, max_pos=MAX_POS),
                  static_argnames=("drop_text",))

    # --- small-shape path: single grid step over all B*NT rows -------------------------
    B, NT = 2, 8
    text = jax.random.randint(k_text_a, (B, NT), 0, TEXT_NUM_EMBEDS, dtype=jnp.int32)

    out = jax.block_until_ready(fwd(text, embed_padded, freqs_cis, drop_text=False))
    ref = text_embedding_ref(text, embed_table, freqs_cis, drop_text=False, max_pos=MAX_POS)
    assert out.shape == (B, NT, D), out.shape
    assert bool(jnp.all(jnp.isfinite(out)))
    np.testing.assert_allclose(np.asarray(out), np.asarray(ref), rtol=1e-5, atol=1e-5)

    out_d = jax.block_until_ready(fwd(text, embed_padded, freqs_cis, drop_text=True))
    ref_d = text_embedding_ref(text, embed_table, freqs_cis, drop_text=True, max_pos=MAX_POS)
    np.testing.assert_allclose(np.asarray(out_d), np.asarray(ref_d), rtol=1e-5, atol=1e-5)

    # --- tiled path: row tiles + per-batch positional wrap (exercises the mod index_map) ---
    B2, NT2 = 2, 520
    text2 = jax.random.randint(k_text_b, (B2, NT2), 0, TEXT_NUM_EMBEDS, dtype=jnp.int32)
    out2 = jax.block_until_ready(fwd(text2, embed_padded, freqs_cis, drop_text=False))
    ref2 = text_embedding_ref(text2, embed_table, freqs_cis, drop_text=False, max_pos=MAX_POS)
    assert out2.shape == (B2, NT2, D), out2.shape
    np.testing.assert_allclose(np.asarray(out2), np.asarray(ref2), rtol=1e-5, atol=1e-5)

    print("KERNEL_OK")
</pallas_src>

<mosaic_0001>
module attributes {stable_mosaic.version = 11 : i64} {
  func.func @_text_embed_kernel(%arg0: i32, %arg1: memref<16x1xi32, #tpu.memory_space<vmem>>, %arg2: memref<128x128xf32, #tpu.memory_space<vmem>>, %arg3: memref<16x128xf32, #tpu.memory_space<vmem>>, %arg4: memref<16x128xf32, #tpu.memory_space<vmem>>) attributes {dimension_semantics = [#tpu.dimension_semantics<parallel>], iteration_bounds = array<i64: 1>, scalar_prefetch = 0 : i64, scratch_operands = 0 : i64, tpu.core_type = #tpu.core_type<tc>, window_params = [{transform_indices = @transform_0, window_bounds = array<i64: 16, 1>}, {pipeline_mode = #tpu.pipeline_mode<synchronous>, transform_indices = @transform_1, window_bounds = array<i64: 128, 128>}, {pipeline_mode = #tpu.pipeline_mode<synchronous>, transform_indices = @transform_2, window_bounds = array<i64: 16, 128>}, {transform_indices = @transform_3, window_bounds = array<i64: 16, 128>}]} {
    %c0 = arith.constant 0 : index
    %c0_0 = arith.constant 0 : index
    %0 = vector.load %arg1[%c0, %c0_0] : memref<16x1xi32, #tpu.memory_space<vmem>>, vector<16x1xi32>
    %1 = tpu.iota {dimensions = array<i32: 1>} : vector<16x128xi32>
    %2 = vector.broadcast %0 : vector<16x1xi32> to vector<16x128xi32>
    %3 = arith.cmpi eq, %1, %2 : vector<16x128xi32>
    %4 = arith.extui %3 : vector<16x128xi1> to vector<16x128xi32>
    %5 = arith.sitofp %4 : vector<16x128xi32> to vector<16x128xf32>
    %c0_1 = arith.constant 0 : index
    %c0_2 = arith.constant 0 : index
    %6 = vector.load %arg2[%c0_1, %c0_2] : memref<128x128xf32, #tpu.memory_space<vmem>>, vector<128x128xf32>
    %cst = arith.constant dense<0.000000e+00> : vector<16x128xf32>
    %7 = tpu.matmul %5, %6, %cst {dimension_numbers = #tpu.dot_dimension_numbers<[1], [0], [0], [1], [0, 0, 1, 1], [], []>} : vector<16x128xf32>, vector<128x128xf32>, vector<16x128xf32> -> vector<16x128xf32>
    %c0_3 = arith.constant 0 : index
    %c0_4 = arith.constant 0 : index
    %8 = vector.load %arg3[%c0_3, %c0_4] : memref<16x128xf32, #tpu.memory_space<vmem>>, vector<16x128xf32>
    %9 = arith.addf %7, %8 : vector<16x128xf32>
    %c0_5 = arith.constant 0 : index
    %c0_6 = arith.constant 0 : index
    %10 = vector.load %arg4[%c0_5, %c0_6] : memref<16x128xf32, #tpu.memory_space<vmem>>, vector<16x128xf32>
    tpu.vector_store %arg4[%c0_5, %c0_6], %9 {strides = array<i32>} : memref<16x128xf32, #tpu.memory_space<vmem>>, vector<16x128xf32>,
    return
  }
  func.func @transform_0(%arg0: i32) -> (i32, i32) {
    %c0_i32 = arith.constant 0 : i32
    %c0_i32_0 = arith.constant 0 : i32
    return %arg0, %c0_i32 : i32, i32
  }
  func.func @transform_1(%arg0: i32) -> (i32, i32) {
    %c0_i32 = arith.constant 0 : i32
    %c0_i32_0 = arith.constant 0 : i32
    %c0_i32_1 = arith.constant 0 : i32
    return %c0_i32, %c0_i32_0 : i32, i32
  }
  func.func @transform_2(%arg0: i32) -> (i32, i32) {
    %c0_i32 = arith.constant 0 : i32
    %c0_i32_0 = arith.constant 0 : i32
    %c0_i32_1 = arith.constant 0 : i32
    return %c0_i32, %c0_i32_0 : i32, i32
  }
  func.func @transform_3(%arg0: i32) -> (i32, i32) {
    %c0_i32 = arith.constant 0 : i32
    %c0_i32_0 = arith.constant 0 : i32
    return %arg0, %c0_i32 : i32, i32
  }
}

</mosaic_0001>

<bundles_post_ra>
// kernel: text_embedding.1
= control target key start
LH: loop header
LB: loop body
LE: loop exit
PB: predicated region body
PF: predicated region fallthrough
CT: control target
= control target key end

     0   :  { %8 = vsyncpa [#allocation3], 0  ;;  %s369_s0 = inlined_call_operand.vmem [shape: s32[16,1], index: 0, kind: input, shape index: {}]   ;;  %s370_s1 = inlined_call_operand.hbm [shape: f32[128,128], index: 1, kind: input, shape index: {}]   ;;  %s371_s2 = inlined_call_operand.vmem [shape: f32[16,128], index: 2, kind: input, shape index: {}]   ;;  %s372_s3 = inlined_call_operand.hbm [shape: f32[16,128], index: 3, kind: output, shape index: {}]  }
   0x1   :  { %9 = vsyncpa [#allocation4], 0  ;;  %s301_s12 = smov [#allocation2]   ;;  %s253_s16 = scalar_lea.hbm %s370_s1, 2048 }
   0x2   :  { %s17_s13 = sshll.u32 %s301_s12, 4  ;;  %p254_p0 = scmp.ne.s32.totalorder %s370_s1, %s253_s16  ;;  %s18_s13 = int_to_ptr.vmem [resolvable:$true] %s17_s13 }
   0x3   :  { %p257_p1 = scmp.lt.u32.totalorder %s253_s16, %s370_s1 }
   0x5   :  { %p259_p2 = pnand %p257_p1, %p254_p0 }
   0x7   :  { %262 = shalt.err (!%p259_p2)
}
   0x8   :  { %s263_s21 = scalar_lea.vmem %s18_s13, 2048  ;;  %p268_p4 = scmp.lt.s32.totalorder %s18_s13, %s18_s13 }
   0x9   :  { %p264_p3 = scmp.ne.s32.totalorder %s18_s13, %s263_s21  ;;  %p269_p5 = scmp.lt.s32.totalorder %s263_s21, %s263_s21 }
   0xb   :  { %p270_p6 = por %p269_p5, %p268_p4 }
   0xd   :  { %p271_p7 = pnand %p270_p6, %p264_p3 }
   0xf   :  { %274 = shalt.err (!%p271_p7)
}
  0x10   :  { %s302_s22 = smov 128   ;;  %s303_s23 = smov 8  }
  0x11   :  { %23 = dma.hbm_to_vmem [thread:$0]  %s370_s1, 2048, %s18_s13, [#allocation3], %s302_s22, %s302_s22, %s303_s23  }
  0x12   :  { %297 = dma.done.wait [#allocation3], 2048  }
  0x13   :  { %298 = vsyncadd [#allocation3], 4294965248  ;;  %v304_v0 = vmov 0   ;;  %v29_v1 = vld [vmem:[%s369_s0] sm:$0xff]  ;;  %v46_v3 = vld [vmem:[#allocation2 + $0x8] sm:$0xff]  ;;  %v31_v27 = vlaneseq  ;;  %v305_v30 = vmov 1.0  }
  0x14   :  { %252 = vset.pattern.permute.xlu0 %v304_v0  ;;  %v45_v2 = vld [vmem:[#allocation2] sm:$0xff]  ;;  %v47_v4 = vld [vmem:[#allocation2 + $0x10] sm:$0xff]  ;;  %v48_v5 = vld [vmem:[#allocation2 + $0x18] sm:$0xff]  ;;  %s306_s5 = smov [#allocation5]  }
  0x15   :  { %34 = vperm.xlu0 %252, %v29_v1   ;;  %v30_v6 = vld [vmem:[%s369_s0 + $0x8] sm:$0xff]  ;;  %v214_v7 = vpack.c.bf16 %v46_v3, %v45_v2  ;;  %v218_v8 = vpack.c.bf16 %v48_v5, %v47_v4  ;;  %v49_v9 = vld [vmem:[#allocation2 + $0x20] sm:$0xff]  ;;  %v51_v12 = vld [vmem:[#allocation2 + $0x30] sm:$0xff]  ;;  %v32_v28 = vand.u32 127, %v31_v27  ;;  %s145_s6 = sshll.u32 %s306_s5, 4  ;;  %s146_s6 = int_to_ptr.vmem [resolvable:$true] %s145_s6 }
  0x16   :  { %v50_v10 = vld [vmem:[#allocation2 + $0x28] sm:$0xff]  ;;  %v52_v13 = vld [vmem:[#allocation2 + $0x38] sm:$0xff]  ;;  %v53_v15 = vld [vmem:[#allocation2 + $0x40] sm:$0xff]  ;;  %s275_s7 = scalar_lea.vmem %s146_s6, 256  ;;  %p280_p9 = scmp.lt.s32.totalorder %s146_s6, %s146_s6 }
  0x17   :  { %215 = vmatprep.subr.bf16.mxu0 %v214_v7  ;;  %v222_v11 = vpack.c.bf16 %v50_v10, %v49_v9  ;;  %v226_v14 = vpack.c.bf16 %v52_v13, %v51_v12  ;;  %v54_v16 = vld [vmem:[#allocation2 + $0x48] sm:$0xff]  ;;  %v55_v18 = vld [vmem:[#allocation2 + $0x50] sm:$0xff]  ;;  %v56_v19 = vld [vmem:[#allocation2 + $0x58] sm:$0xff]  ;;  %p276_p8 = scmp.ne.s32.totalorder %s146_s6, %s275_s7  ;;  %p281_p10 = scmp.lt.s32.totalorder %s275_s7, %s275_s7 }
  0x18   :  { %217 = vmatpush3.bf16.msra.mxu0 %v214_v7  ;;  %v230_v17 = vpack.c.bf16 %v54_v16, %v53_v15  ;;  %v234_v20 = vpack.c.bf16 %v56_v19, %v55_v18  ;;  %v57_v21 = vld [vmem:[#allocation2 + $0x60] sm:$0xff]  ;;  %v58_v22 = vld [vmem:[#allocation2 + $0x68] sm:$0xff]  ;;  %v59_v24 = vld [vmem:[#allocation2 + $0x70] sm:$0xff] }
  0x19   :  { %37 = vperm.xlu0 %252, %v30_v6   ;;  %219 = vmatprep.subr.bf16.mxu0 %v218_v8  ;;  %v238_v23 = vpack.c.bf16 %v58_v22, %v57_v21  ;;  %v60_v25 = vld [vmem:[#allocation2 + $0x78] sm:$0xff]  ;;  %v62_v32 = vld [vmem:[%s371_s2 + $0x8] sm:$0xff]  ;;  %v61_v33 = vld [vmem:[%s371_s2] sm:$0xff]  ;;  %p282_p11 = por %p281_p10, %p280_p9 }
  0x1a   :  { %v242_v26 = vpack.c.bf16 %v60_v25, %v59_v24 }
  0x1b   :  { %p283_p12 = pnand %p282_p11, %p276_p8 }
  0x1c   :  { %221 = vmatpush3.bf16.msra.mxu0 %v218_v8 }
  0x1d   :  { %223 = vmatprep.subr.bf16.mxu0 %v222_v11 }
  0x20   :  { %225 = vmatpush3.bf16.msra.mxu0 %v222_v11 }
  0x21   :  { %227 = vmatprep.subr.bf16.mxu0 %v226_v14 }
  0x24   :  { %229 = vmatpush3.bf16.msra.mxu0 %v226_v14 }
  0x25   :  { %231 = vmatprep.subr.bf16.mxu0 %v230_v17 }
  0x28   :  { %233 = vmatpush3.bf16.msra.mxu0 %v230_v17 }
  0x29   :  { %235 = vmatprep.subr.bf16.mxu0 %v234_v20 }
  0x2c   :  { %237 = vmatpush3.bf16.msra.mxu0 %v234_v20 }
  0x2d   :  { %239 = vmatprep.subr.bf16.mxu0 %v238_v23 }
  0x30   :  { %241 = vmatpush3.bf16.msra.mxu0 %v238_v23 }
  0x31   :  { %243 = vmatprep.subr.bf16.mxu0 %v242_v26 }
  0x34   :  { %245 = vmatpush3.bf16.msra.mxu0 %v242_v26 }
  0x94   :  { %v35_v29 = vpop.permute.xlu0 %34 }
  0x95   :  { %vm39_vm0 = vcmp.eq.s32.totalorder %v32_v28, %v35_v29 }
  0x96   :  { %211 = vmatprep.mubr.msk.f32.mxu0 %vm39_vm0, %v305_v30 }
  0x98   :  { %v38_v31 = vpop.permute.xlu0 %37 }
  0x99   :  { %vm40_vm1 = vcmp.eq.s32.totalorder %v32_v28, %v38_v31 }
  0x9a   :  { %212 = vmatmul.mubr.msk.f32.vlgmr.msra.gmra.mrb[0].mxu0 %vm40_vm1, %v305_v30 }
 0x16d   :  { %v213_v34 = vpop.f32.mrb[0].mxu0 }
 0x16e   :  { %v135_v35 = vadd.f32 %v213_v34, %v62_v32  ;;  %v129_v36 = vpop.f32.mrb[1].mxu0 }
 0x16f   :  { %v130_v37 = vadd.f32 %v129_v36, %v61_v33 }
 0x170   :  { %139 = vst [vmem:[#allocation5 + $0x8] sm:$0xff] %v135_v35 }
 0x171   :  { %138 = vst [vmem:[#allocation5] sm:$0xff] %v130_v37 }
 0x172   :  { %286 = shalt.err (!%p283_p12)
}
 0x173   :  { %s287_s2 = scalar_lea.hbm %s372_s3, 256 }
 0x174   :  { %p288_p13 = scmp.ne.s32.totalorder %s372_s3, %s287_s2  ;;  %p291_p0 = scmp.lt.u32.totalorder %s287_s2, %s372_s3 }
 0x176   :  { %p293_p1 = pnand %p291_p0, %p288_p13 }
 0x178   :  { %296 = shalt.err (!%p293_p1)
}
 0x179   :  { %151 = dma.vmem_to_hbm [thread:$0]  %s146_s6, 256, %s372_s3, [#allocation4], %s302_s22, %s302_s22, %s303_s23  }
 0x17a   :  { %299 = dma.done.wait [#allocation4], 256  }
 0x17b   :  { %300 = vsyncadd [#allocation4], 4294967040 }
 0x17c   :  { %155 = vsyncpa [#allocation3], 1 }
 0x17d   :  { %156 = vsyncpa [#allocation4], 1 }

</bundles_post_ra>
